<compile_context>
chip_gen: v7x
topology: tpu7x:2x2x1
jax: 0.10.0
libtpu: 0.0.40
codegen_flags: <defaults>
</compile_context>

<pallas_src>
import jax
import jax.numpy as jnp
from jax import lax
from jax.experimental import pallas as pl
from jax.experimental.pallas import tpu as pltpu

LANE = 128


def _round_up(x: int, m: int) -> int:
    return ((x + m - 1) // m) * m


def _cdiv(a: int, b: int) -> int:
    return -(-a // b)


def _dynamics_kernel(state_ref, action_ref, act_table_ref, w_s_ref, w_blk_ref,
                     b_blk_ref, w_r_ref, b_r_ref, next_state_ref, reward_ref):
    """Fused dynamics forward for one batch tile.

    state_ref:     (TILE_B, H_pad)   bf16  current hidden state (zero-padded lanes)
    action_ref:    (TILE_B, 1)       i32   action indices
    act_table_ref: (A_pad, H_pad)    bf16  embedding @ W_in_act + b_in (resident)
    w_s_ref:       (H_pad, H_pad)    bf16  state half of the input projection (resident)
    w_blk_ref:     (nb, H_pad, H_pad) bf16 residual block weights (resident)
    b_blk_ref:     (nb, H_pad)       f32   residual block biases (resident)
    w_r_ref:       (1, H_pad)        f32   reward head weights (resident)
    b_r_ref:       (1, 1)            f32   reward bias (SMEM scalar)
    outputs: next_state (TILE_B, H_pad) f32, reward (TILE_B, 1) f32
    """
    tile_b = state_ref.shape[0]
    a_pad = act_table_ref.shape[0]

    # In-kernel action gather: one-hot selection of bf16 table rows on the MXU.
    # (Exact selection; negligible cost for action spaces up to a few hundred.)
    onehot = (action_ref[...] ==
              lax.broadcasted_iota(jnp.int32, (tile_b, a_pad), 1)).astype(jnp.bfloat16)
    act_contrib = jnp.dot(onehot, act_table_ref[...],
                          preferred_element_type=jnp.float32)

    # Input projection (state half, MXU bf16 in / f32 acc) + folded action half, ReLU.
    h = jnp.dot(state_ref[...], w_s_ref[...], preferred_element_type=jnp.float32)
    h = jnp.maximum(h + act_contrib, 0.0)

    # Residual blocks: h = h + relu(h @ W_blk[k] + b_blk[k])
    num_blocks = w_blk_ref.shape[0]

    def block_step(k, h):
        y = jnp.dot(h.astype(jnp.bfloat16), w_blk_ref[k],
                    preferred_element_type=jnp.float32)
        y = y + b_blk_ref[pl.ds(k, 1), :]
        return h + jnp.maximum(y, 0.0)

    if num_blocks <= 4:
        for k in range(num_blocks):          # static unroll for small nb
            h = block_step(k, h)
    else:                                    # keep code size / vreg pressure bounded
        h = lax.fori_loop(0, num_blocks, block_step, h)

    next_state_ref[...] = h.astype(next_state_ref.dtype)

    # Reward head: VPU multiply + lane reduce (avoids an N=1 MXU matmul), SMEM bias,
    # narrow (TILE_B, 1) store (writeback bytes == useful bytes).
    r = jnp.sum(h * w_r_ref[...], axis=-1, keepdims=True) + b_r_ref[0, 0]
    reward_ref[...] = r.astype(reward_ref.dtype)


def init_params(key, hidden_dim, action_space_size, num_blocks):
    """Deterministic synthetic initialization (PyTorch-like layout & scales)."""
    ks = jax.random.split(key, 6)
    H = hidden_dim
    lim_in = 1.0 / jnp.sqrt(2.0 * H)
    lim_h = 1.0 / jnp.sqrt(1.0 * H)
    return {
        "embedding": jax.random.normal(ks[0], (action_space_size, H), jnp.float32),
        "w_in": jax.random.uniform(ks[1], (2 * H, H), jnp.float32, -lim_in, lim_in),
        "b_in": jnp.zeros((1, H), jnp.float32),
        "w_blk": jax.random.uniform(ks[2], (num_blocks, H, H), jnp.float32, -lim_h, lim_h),
        "b_blk": jnp.zeros((num_blocks, 1, H), jnp.float32),
        "w_r": jax.random.uniform(ks[3], (H, 1), jnp.float32, -lim_h, lim_h),
        "b_r": jnp.zeros((1, 1), jnp.float32),
    }


def prepare_kernel_params(params, lane=LANE):
    """One-time transform of the logical params into the kernel layout:
    split W_in, fold the embedding gather + its projection + b_in into a small
    (A_pad, H_pad) bf16 table, zero-pad the feature dim to a lane multiple, pack
    block biases densely, and cast MXU weights to bf16."""
    # TODO(synk): benchmark lane=256 on v6e/v7x (256x256 MXU) for compute-bound H.
    H = params["w_in"].shape[1]
    A = params["embedding"].shape[0]
    H_pad = _round_up(H, lane)
    A_pad = _round_up(A, lane)
    dH = H_pad - H
    nb = params["w_blk"].shape[0]

    w_in_state = params["w_in"][:H]                              # (H, H)
    w_in_act = params["w_in"][H:]                                # (H, H)
    act_table = params["embedding"] @ w_in_act + params["b_in"]  # (A, H), folded in f32
    b_blk = params["b_blk"].reshape(nb, H)                       # dense (nb, H)

    return {
        "act_table": jnp.pad(act_table, ((0, A_pad - A), (0, dH))).astype(jnp.bfloat16),
        "w_s": jnp.pad(w_in_state, ((0, dH), (0, dH))).astype(jnp.bfloat16),
        "w_blk": jnp.pad(params["w_blk"], ((0, 0), (0, dH), (0, dH))).astype(jnp.bfloat16),
        "b_blk": jnp.pad(b_blk, ((0, 0), (0, dH))).astype(jnp.float32),
        "w_r": jnp.pad(params["w_r"].T, ((0, 0), (0, dH))).astype(jnp.float32),  # (1, H_pad)
        "b_r": params["b_r"].astype(jnp.float32),                                 # (1, 1) -> SMEM
    }


def _choose_batch_tiling(B, requested_tile_b):
    """Pick (tile_b, n_tiles, B_pad): avoid pathological padding, and give v7x's
    two TensorCores >=2 tiles once the batch is big enough to split."""
    B8 = _round_up(max(B, 8), 8)
    tb = min(requested_tile_b, B8)
    n_tiles = _cdiv(B8, tb)
    if n_tiles == 1 and B8 >= 256:
        n_tiles = 2
    tb = _round_up(_cdiv(B8, n_tiles), 8)     # rebalance -> minimal last-tile padding
    n_tiles = _cdiv(B8, tb)
    return tb, n_tiles, tb * n_tiles


def dynamics_forward(state, action, kparams, *, tile_b=512):
    """state: (B, H) f32, action: (B,) int -> (next_state (B, H) f32, reward (B, 1) f32)."""
    B, H = state.shape
    H_pad = kparams["w_s"].shape[0]
    A_pad = kparams["act_table"].shape[0]
    nb = kparams["w_blk"].shape[0]

    tb, n_tiles, B_pad = _choose_batch_tiling(B, tile_b)

    # Stream the state in bf16 (MXU operand dtype); pad batch/feature dims (exact: zeros).
    state_p = jnp.pad(state, ((0, B_pad - B), (0, H_pad - H))).astype(jnp.bfloat16)
    action_p = jnp.pad(action.astype(jnp.int32), (0, B_pad - B)).reshape(B_pad, 1)

    # VMEM budget: resident weights (counted double-buffered, conservative) +
    # double-buffered streamed tiles + margin; cap from the real chip capacity.
    weight_bytes = (A_pad * H_pad * 2 + H_pad * H_pad * 2 + nb * H_pad * H_pad * 2
                    + _round_up(nb, 8) * H_pad * 4 + 8 * H_pad * 4)
    tile_bytes = tb * (H_pad * 2 + H_pad * 4) + 2 * tb * 512   # state in + h out + narrow cols
    vmem_need = 2 * weight_bytes + 2 * tile_bytes + (2 << 20)
    try:
        vmem_cap = int(getattr(pltpu.get_tpu_info(), "vmem_capacity_bytes", 64 << 20))
    except Exception:
        vmem_cap = 64 << 20
    vmem_limit = int(min(vmem_cap - (8 << 20), max(vmem_need, 32 << 20)))

    batch_in_spec = pl.BlockSpec((tb, H_pad), lambda i: (i, 0))

    next_state_p, reward_col = pl.pallas_call(
        _dynamics_kernel,
        grid=(n_tiles,),
        in_specs=[
            batch_in_spec,                                            # state tile (bf16)
            pl.BlockSpec((tb, 1), lambda i: (i, 0)),                  # action indices
            pl.BlockSpec((A_pad, H_pad), lambda i: (0, 0)),           # act_table (resident)
            pl.BlockSpec((H_pad, H_pad), lambda i: (0, 0)),           # w_s (resident)
            pl.BlockSpec((nb, H_pad, H_pad), lambda i: (0, 0, 0)),    # w_blk (resident)
            pl.BlockSpec((nb, H_pad), lambda i: (0, 0)),              # b_blk (resident)
            pl.BlockSpec((1, H_pad), lambda i: (0, 0)),               # w_r row (resident)
            pl.BlockSpec(memory_space=pltpu.MemorySpace.SMEM),        # b_r scalar in SMEM
        ],
        out_specs=(
            pl.BlockSpec((tb, H_pad), lambda i: (i, 0)),              # next_state
            pl.BlockSpec((tb, 1), lambda i: (i, 0)),                  # reward (narrow)
        ),
        out_shape=(
            jax.ShapeDtypeStruct((B_pad, H_pad), jnp.float32),
            jax.ShapeDtypeStruct((B_pad, 1), jnp.float32),
        ),
        compiler_params=pltpu.CompilerParams(
            dimension_semantics=("parallel",),    # batch tiles split across TCs (v7x)
            vmem_limit_bytes=vmem_limit,
        ),
    )(state_p, action_p, kparams["act_table"], kparams["w_s"], kparams["w_blk"],
      kparams["b_blk"], kparams["w_r"], kparams["b_r"])

    return next_state_p[:B, :H], reward_col[:B]


def _reference_forward(state, action, params):
    """Pure-JAX f32 reference for correctness checking."""
    emb = jnp.take(params["embedding"], action, axis=0)
    x = jnp.concatenate([state, emb], axis=-1)
    h = jnp.maximum(x @ params["w_in"] + params["b_in"], 0.0)
    for k in range(params["w_blk"].shape[0]):
        h = h + jnp.maximum(h @ params["w_blk"][k] + params["b_blk"][k], 0.0)
    return h, h @ params["w_r"] + params["b_r"]


if __name__ == "__main__":
    batch = 8
    hidden_dim = 32
    action_space_size = 6
    num_blocks = 2

    key = jax.random.PRNGKey(0)
    k_state, k_action, k_params = jax.random.split(key, 3)

    state = jax.random.normal(k_state, (batch, hidden_dim), jnp.float32)
    action = jax.random.randint(k_action, (batch,), 0, action_space_size, jnp.int32)
    params = init_params(k_params, hidden_dim, action_space_size, num_blocks)
    kparams = prepare_kernel_params(params)

    fwd = jax.jit(dynamics_forward)
    next_state, reward = fwd(state, action, kparams)
    jax.block_until_ready((next_state, reward))

    ref_ns, ref_r = _reference_forward(state, action, params)
    assert next_state.shape == (batch, hidden_dim)
    assert reward.shape == (batch, 1)
    # bf16 MXU operands (state / weights / folded action table) with f32 accumulation
    # -> relaxed tolerance vs the f32 reference.
    assert jnp.allclose(next_state, ref_ns, atol=3e-2, rtol=3e-2), (
        float(jnp.max(jnp.abs(next_state - ref_ns))))
    assert jnp.allclose(reward, ref_r, atol=3e-2, rtol=3e-2), (
        float(jnp.max(jnp.abs(reward - ref_r))))

    print("KERNEL_OK")
</pallas_src>

<mosaic_0001>
module attributes {stable_mosaic.version = 11 : i64} {
  func.func @_dynamics_kernel(%arg0: i32, %arg1: memref<8x128xbf16, #tpu.memory_space<vmem>>, %arg2: memref<8x1xi32, #tpu.memory_space<vmem>>, %arg3: memref<128x128xbf16, #tpu.memory_space<vmem>>, %arg4: memref<128x128xbf16, #tpu.memory_space<vmem>>, %arg5: memref<2x128x128xbf16, #tpu.memory_space<vmem>>, %arg6: memref<2x128xf32, #tpu.memory_space<vmem>>, %arg7: memref<1x128xf32, #tpu.memory_space<vmem>>, %arg8: memref<1x1xf32, #tpu.memory_space<smem>>, %arg9: memref<8x128xf32, #tpu.memory_space<vmem>>, %arg10: memref<8x1xf32, #tpu.memory_space<vmem>>) attributes {dimension_semantics = [#tpu.dimension_semantics<parallel>], iteration_bounds = array<i64: 1>, scalar_prefetch = 0 : i64, scratch_operands = 0 : i64, tpu.core_type = #tpu.core_type<tc>, window_params = [{transform_indices = @transform_0, window_bounds = array<i64: 8, 128>}, {transform_indices = @transform_1, window_bounds = array<i64: 8, 1>}, {pipeline_mode = #tpu.pipeline_mode<synchronous>, transform_indices = @transform_2, window_bounds = array<i64: 128, 128>}, {pipeline_mode = #tpu.pipeline_mode<synchronous>, transform_indices = @transform_3, window_bounds = array<i64: 128, 128>}, {pipeline_mode = #tpu.pipeline_mode<synchronous>, transform_indices = @transform_4, window_bounds = array<i64: 2, 128, 128>}, {pipeline_mode = #tpu.pipeline_mode<synchronous>, transform_indices = @transform_5, window_bounds = array<i64: 2, 128>}, {pipeline_mode = #tpu.pipeline_mode<synchronous>, transform_indices = @transform_6, window_bounds = array<i64: 1, 128>}, {transform_indices = @transform_7, window_bounds = array<i64: 1, 1>}, {transform_indices = @transform_8, window_bounds = array<i64: 8, 128>}, {transform_indices = @transform_9, window_bounds = array<i64: 8, 1>}]} {
    %c0 = arith.constant 0 : index
    %c0_0 = arith.constant 0 : index
    %0 = vector.load %arg2[%c0, %c0_0] : memref<8x1xi32, #tpu.memory_space<vmem>>, vector<8x1xi32>
    %1 = tpu.iota {dimensions = array<i32: 1>} : vector<8x128xi32>
    %2 = vector.broadcast %0 : vector<8x1xi32> to vector<8x128xi32>
    %3 = arith.cmpi eq, %2, %1 : vector<8x128xi32>
    %4 = arith.extui %3 : vector<8x128xi1> to vector<8x128xi32>
    %5 = arith.sitofp %4 : vector<8x128xi32> to vector<8x128xf32>
    %6 = arith.truncf %5 : vector<8x128xf32> to vector<8x128xbf16>
    %c0_1 = arith.constant 0 : index
    %c0_2 = arith.constant 0 : index
    %7 = vector.load %arg3[%c0_1, %c0_2] : memref<128x128xbf16, #tpu.memory_space<vmem>>, vector<128x128xbf16>
    %cst = arith.constant dense<0.000000e+00> : vector<8x128xf32>
    %8 = tpu.matmul %6, %7, %cst {dimension_numbers = #tpu.dot_dimension_numbers<[1], [0], [0], [1], [0, 0, 1, 1], [], []>} : vector<8x128xbf16>, vector<128x128xbf16>, vector<8x128xf32> -> vector<8x128xf32>
    %c0_3 = arith.constant 0 : index
    %c0_4 = arith.constant 0 : index
    %9 = vector.load %arg1[%c0_3, %c0_4] : memref<8x128xbf16, #tpu.memory_space<vmem>>, vector<8x128xbf16>
    %c0_5 = arith.constant 0 : index
    %c0_6 = arith.constant 0 : index
    %10 = vector.load %arg4[%c0_5, %c0_6] : memref<128x128xbf16, #tpu.memory_space<vmem>>, vector<128x128xbf16>
    %cst_7 = arith.constant dense<0.000000e+00> : vector<8x128xf32>
    %11 = tpu.matmul %9, %10, %cst_7 {dimension_numbers = #tpu.dot_dimension_numbers<[1], [0], [0], [1], [0, 0, 1, 1], [], []>} : vector<8x128xbf16>, vector<128x128xbf16>, vector<8x128xf32> -> vector<8x128xf32>
    %12 = arith.addf %11, %8 : vector<8x128xf32>
    %cst_8 = arith.constant 0.000000e+00 : f32
    %13 = vector.broadcast %cst_8 : f32 to vector<8x128xf32>
    %14 = arith.maximumf %12, %13 : vector<8x128xf32>
    %15 = arith.truncf %14 : vector<8x128xf32> to vector<8x128xbf16>
    %c0_9 = arith.constant 0 : index
    %c0_10 = arith.constant 0 : index
    %c0_11 = arith.constant 0 : index
    %16 = vector.load %arg5[%c0_9, %c0_10, %c0_11] : memref<2x128x128xbf16, #tpu.memory_space<vmem>>, vector<1x128x128xbf16>
    %17 = vector.shape_cast %16 : vector<1x128x128xbf16> to vector<128x128xbf16>
    %cst_12 = arith.constant dense<0.000000e+00> : vector<8x128xf32>
    %18 = tpu.matmul %15, %17, %cst_12 {dimension_numbers = #tpu.dot_dimension_numbers<[1], [0], [0], [1], [0, 0, 1, 1], [], []>} : vector<8x128xbf16>, vector<128x128xbf16>, vector<8x128xf32> -> vector<8x128xf32>
    %c0_13 = arith.constant 0 : index
    %c0_14 = arith.constant 0 : index
    %19 = vector.load %arg6[%c0_13, %c0_14] : memref<2x128xf32, #tpu.memory_space<vmem>>, vector<1x128xf32>
    %20 = vector.broadcast %19 : vector<1x128xf32> to vector<8x128xf32>
    %21 = arith.addf %18, %20 : vector<8x128xf32>
    %cst_15 = arith.constant 0.000000e+00 : f32
    %22 = vector.broadcast %cst_15 : f32 to vector<8x128xf32>
    %23 = arith.maximumf %21, %22 : vector<8x128xf32>
    %24 = arith.addf %14, %23 : vector<8x128xf32>
    %25 = arith.truncf %24 : vector<8x128xf32> to vector<8x128xbf16>
    %c1 = arith.constant 1 : index
    %c0_16 = arith.constant 0 : index
    %c0_17 = arith.constant 0 : index
    %26 = vector.load %arg5[%c1, %c0_16, %c0_17] : memref<2x128x128xbf16, #tpu.memory_space<vmem>>, vector<1x128x128xbf16>
    %27 = vector.shape_cast %26 : vector<1x128x128xbf16> to vector<128x128xbf16>
    %cst_18 = arith.constant dense<0.000000e+00> : vector<8x128xf32>
    %28 = tpu.matmul %25, %27, %cst_18 {dimension_numbers = #tpu.dot_dimension_numbers<[1], [0], [0], [1], [0, 0, 1, 1], [], []>} : vector<8x128xbf16>, vector<128x128xbf16>, vector<8x128xf32> -> vector<8x128xf32>
    %c1_19 = arith.constant 1 : index
    %c0_20 = arith.constant 0 : index
    %29 = vector.load %arg6[%c1_19, %c0_20] : memref<2x128xf32, #tpu.memory_space<vmem>>, vector<1x128xf32>
    %30 = vector.broadcast %29 : vector<1x128xf32> to vector<8x128xf32>
    %31 = arith.addf %28, %30 : vector<8x128xf32>
    %cst_21 = arith.constant 0.000000e+00 : f32
    %32 = vector.broadcast %cst_21 : f32 to vector<8x128xf32>
    %33 = arith.maximumf %31, %32 : vector<8x128xf32>
    %34 = arith.addf %24, %33 : vector<8x128xf32>
    %c0_22 = arith.constant 0 : index
    %c0_23 = arith.constant 0 : index
    %35 = vector.load %arg9[%c0_22, %c0_23] : memref<8x128xf32, #tpu.memory_space<vmem>>, vector<8x128xf32>
    tpu.vector_store %arg9[%c0_22, %c0_23], %34 {strides = array<i32>} : memref<8x128xf32, #tpu.memory_space<vmem>>, vector<8x128xf32>,
    %c0_24 = arith.constant 0 : index
    %c0_25 = arith.constant 0 : index
    %36 = vector.load %arg7[%c0_24, %c0_25] : memref<1x128xf32, #tpu.memory_space<vmem>>, vector<1x128xf32>
    %37 = vector.broadcast %36 : vector<1x128xf32> to vector<8x128xf32>
    %38 = arith.mulf %34, %37 : vector<8x128xf32>
    %cst_26 = arith.constant dense<0.000000e+00> : vector<8xf32>
    %39 = vector.multi_reduction <add>, %38, %cst_26 [1] : vector<8x128xf32> to vector<8xf32>
    %40 = vector.shape_cast %39 : vector<8xf32> to vector<8x1xf32>
    %c0_27 = arith.constant 0 : index
    %c0_28 = arith.constant 0 : index
    %41 = memref.load %arg8[%c0_27, %c0_28] : memref<1x1xf32, #tpu.memory_space<smem>>
    %42 = vector.broadcast %41 : f32 to vector<8x1xf32>
    %43 = arith.addf %40, %42 : vector<8x1xf32>
    %c0_29 = arith.constant 0 : index
    %c0_30 = arith.constant 0 : index
    %44 = vector.load %arg10[%c0_29, %c0_30] : memref<8x1xf32, #tpu.memory_space<vmem>>, vector<8x1xf32>
    tpu.vector_store %arg10[%c0_29, %c0_30], %43 {strides = array<i32>} : memref<8x1xf32, #tpu.memory_space<vmem>>, vector<8x1xf32>,
    return
  }
  func.func @transform_0(%arg0: i32) -> (i32, i32) {
    %c0_i32 = arith.constant 0 : i32
    %c0_i32_0 = arith.constant 0 : i32
    return %arg0, %c0_i32 : i32, i32
  }
  func.func @transform_1(%arg0: i32) -> (i32, i32) {
    %c0_i32 = arith.constant 0 : i32
    %c0_i32_0 = arith.constant 0 : i32
    return %arg0, %c0_i32 : i32, i32
  }
  func.func @transform_2(%arg0: i32) -> (i32, i32) {
    %c0_i32 = arith.constant 0 : i32
    %c0_i32_0 = arith.constant 0 : i32
    %c0_i32_1 = arith.constant 0 : i32
    return %c0_i32, %c0_i32_0 : i32, i32
  }
  func.func @transform_3(%arg0: i32) -> (i32, i32) {
    %c0_i32 = arith.constant 0 : i32
    %c0_i32_0 = arith.constant 0 : i32
    %c0_i32_1 = arith.constant 0 : i32
    return %c0_i32, %c0_i32_0 : i32, i32
  }
  func.func @transform_4(%arg0: i32) -> (i32, i32, i32) {
    %c0_i32 = arith.constant 0 : i32
    %c0_i32_0 = arith.constant 0 : i32
    %c0_i32_1 = arith.constant 0 : i32
    %c0_i32_2 = arith.constant 0 : i32
    return %c0_i32, %c0_i32_0, %c0_i32_1 : i32, i32, i32
  }
  func.func @transform_5(%arg0: i32) -> (i32, i32) {
    %c0_i32 = arith.constant 0 : i32
    %c0_i32_0 = arith.constant 0 : i32
    %c0_i32_1 = arith.constant 0 : i32
    return %c0_i32, %c0_i32_0 : i32, i32
  }
  func.func @transform_6(%arg0: i32) -> (i32, i32) {
    %c0_i32 = arith.constant 0 : i32
    %c0_i32_0 = arith.constant 0 : i32
    %c0_i32_1 = arith.constant 0 : i32
    return %c0_i32, %c0_i32_0 : i32, i32
  }
  func.func @transform_7(%arg0: i32) -> (i32, i32) {
    %c0_i32 = arith.constant 0 : i32
    %c0_i32_0 = arith.constant 0 : i32
    %c0_i32_1 = arith.constant 0 : i32
    return %c0_i32, %c0_i32_0 : i32, i32
  }
  func.func @transform_8(%arg0: i32) -> (i32, i32) {
    %c0_i32 = arith.constant 0 : i32
    %c0_i32_0 = arith.constant 0 : i32
    return %arg0, %c0_i32 : i32, i32
  }
  func.func @transform_9(%arg0: i32) -> (i32, i32) {
    %c0_i32 = arith.constant 0 : i32
    %c0_i32_0 = arith.constant 0 : i32
    return %arg0, %c0_i32 : i32, i32
  }
}

</mosaic_0001>

<bundles_post_ra>
// kernel: dynamics_forward.1
= control target key start
LH: loop header
LB: loop body
LE: loop exit
PB: predicated region body
PF: predicated region fallthrough
CT: control target
= control target key end

     0   :  { %16 = vsyncpa [#allocation4], 0  ;;  %s1036_s0 = inlined_call_operand.vmem [shape: bf16[8,128], index: 0, kind: input, shape index: {}]   ;;  %s1037_s1 = inlined_call_operand.vmem [shape: s32[8,1], index: 1, kind: input, shape index: {}]   ;;  %s1038_s2 = inlined_call_operand.hbm [shape: bf16[128,128], index: 2, kind: input, shape index: {}]   ;;  %s1039_s3 = inlined_call_operand.hbm [shape: bf16[128,128], index: 3, kind: input, shape index: {}]   ;;  %s1040_s4 = inlined_call_operand.hbm [shape: bf16[2,128,128], index: 4, kind: input, shape index: {}]   ;;  %s1041_s5 = inlined_call_operand.vmem [shape: f32[2,128], index: 5, kind: input, shape index: {}]   ;;  %s1042_s6 = inlined_call_operand.vmem [shape: f32[1,128], index: 6, kind: input, shape index: {}]   ;;  %s1043_s7 = inlined_call_operand.<no memory space> [shape: f32[1,1], index: 7, kind: input, shape index: {}]   ;;  %s1044_s8 = inlined_call_operand.hbm [shape: f32[8,128], index: 8, kind: output, shape index: {0}]   ;;  %s1045_s9 = inlined_call_operand.vmem [shape: f32[8,1], index: 9, kind: output, shape index: {1}]  }
   0x1   :  { %17 = vsyncpa [#allocation7], 0 }
   0x2   :  { %18 = vsyncpa [#allocation5], 0  ;;  %s851_s30 = smov [#allocation6]   ;;  %s852_s11 = smov [#allocation3]  }
   0x3   :  { %s40_s10 = sshll.u32 %s851_s30, 4  ;;  %s28_s12 = sshll.u32 %s852_s11, 4  ;;  %s41_s10 = int_to_ptr.vmem [resolvable:$true] %s40_s10  ;;  %s911_s12 = int_to_ptr.vmem [resolvable:$true] %s28_s12 }
   0x4   :  { %s757_s15 = scalar_lea.hbm %s1039_s3, 1024 }
   0x5   :  { %p758_p0 = scmp.ne.s32.totalorder %s1039_s3, %s757_s15  ;;  %p761_p1 = scmp.lt.u32.totalorder %s757_s15, %s1039_s3 }
   0x7   :  { %p763_p2 = pnand %p761_p1, %p758_p0 }
   0x9   :  { %766 = shalt.err (!%p763_p2)
}
   0xa   :  { %s767_s20 = scalar_lea.vmem %s41_s10, 1024  ;;  %p772_p4 = scmp.lt.s32.totalorder %s41_s10, %s41_s10 }
   0xb   :  { %p768_p3 = scmp.ne.s32.totalorder %s41_s10, %s767_s20  ;;  %p773_p5 = scmp.lt.s32.totalorder %s767_s20, %s767_s20 }
   0xd   :  { %p774_p6 = por %p773_p5, %p772_p4 }
   0xf   :  { %p775_p7 = pnand %p774_p6, %p768_p3 }
  0x11   :  { %778 = shalt.err (!%p775_p7)
}
  0x12   :  { %s853_s21 = smov 64   ;;  %s854_s22 = smov 4  }
  0x13   :  { %46 = dma.hbm_to_vmem [thread:$0]  %s1039_s3, 1024, %s41_s10, [#allocation7], %s853_s21, %s853_s21, %s854_s22  }
  0x14   :  { %s779_s27 = scalar_lea.hbm %s1038_s2, 1024 }
  0x15   :  { %p780_p8 = scmp.ne.s32.totalorder %s1038_s2, %s779_s27  ;;  %p783_p9 = scmp.lt.u32.totalorder %s779_s27, %s1038_s2 }
  0x17   :  { %p785_p10 = pnand %p783_p9, %p780_p8 }
  0x19   :  { %788 = shalt.err (!%p785_p10)
}
  0x1a   :  { %s789_s13 = scalar_lea.vmem %s911_s12, 1024  ;;  %p794_p12 = scmp.lt.s32.totalorder %s911_s12, %s911_s12 }
  0x1b   :  { %p790_p11 = scmp.ne.s32.totalorder %s911_s12, %s789_s13  ;;  %p795_p13 = scmp.lt.s32.totalorder %s789_s13, %s789_s13 }
  0x1d   :  { %p796_p0 = por %p795_p13, %p794_p12 }
  0x1f   :  { %p797_p1 = pnand %p796_p0, %p790_p11 }
  0x21   :  { %800 = shalt.err (!%p797_p1)
}
  0x22   :  { %34 = dma.hbm_to_vmem [thread:$0]  %s1038_s2, 1024, %s911_s12, [#allocation4], %s853_s21, %s853_s21, %s854_s22  }
  0x23   :  { %s855_s14 = smov [#allocation8]   ;;  %s801_s18 = scalar_lea.hbm %s1040_s4, 2048 }
  0x24   :  { %s52_s15 = sshll.u32 %s855_s14, 4  ;;  %p802_p2 = scmp.ne.s32.totalorder %s1040_s4, %s801_s18  ;;  %s53_s15 = int_to_ptr.vmem [resolvable:$true] %s52_s15 }
  0x25   :  { %p805_p3 = scmp.lt.u32.totalorder %s801_s18, %s1040_s4 }
  0x27   :  { %p807_p4 = pnand %p805_p3, %p802_p2 }
  0x29   :  { %810 = shalt.err (!%p807_p4)
}
  0x2a   :  { %s811_s25 = scalar_lea.vmem %s53_s15, 2048  ;;  %p816_p6 = scmp.lt.s32.totalorder %s53_s15, %s53_s15 }
  0x2b   :  { %p812_p5 = scmp.ne.s32.totalorder %s53_s15, %s811_s25  ;;  %p817_p7 = scmp.lt.s32.totalorder %s811_s25, %s811_s25 }
  0x2d   :  { %p818_p8 = por %p817_p7, %p816_p6 }
  0x2f   :  { %p819_p9 = pnand %p818_p8, %p812_p5 }
  0x31   :  { %822 = shalt.err (!%p819_p9)
}
  0x32   :  { %58 = dma.hbm_to_vmem [thread:$0]  %s1040_s4, 2048, %s53_s15, [#allocation7], %s853_s21, %s853_s21, %s854_s22  }
  0x33   :  { %845 = dma.done.wait [#allocation4], 1024  }
  0x34   :  { %846 = vsyncadd [#allocation4], 4294966272 }
  0x35   :  { %847 = dma.done.wait [#allocation7], 3072  }
  0x36   :  { %848 = vsyncadd [#allocation7], 4294964224  ;;  %v856_v0 = vmov 0   ;;  %v857_v1 = vmov 0.0   ;;  %v75_v2 = vld [vmem:[%s1037_s1] sm:$0xff]  ;;  %vm858_vm0 = vmmov 0   ;;  %v76_v18 = vlaneseq }
  0x37   :  { %724 = vset.pattern.permute.xlu0 %v856_v0  ;;  %630 = vmatprep.subr.bf16.mxu0 %v857_v1  ;;  %v725_v3 = vld [vmem:[#allocation3] sm:$0xff]   ;;  %v726_v4 = vld [vmem:[#allocation3 + $0x8] sm:$0xff]   ;;  %v727_v5 = vld [vmem:[#allocation3 + $0x10] sm:$0xff]   ;;  %v859_v22 = vmov 1.0|1.0   ;;  %s860_s11 = smov [#allocation9]  }
  0x38   :  { %670 = vmatprep.subr.bf16.mxu1 %v857_v1  ;;  %79 = vperm.xlu0 %724, %v75_v2   ;;  %v728_v6 = vld [vmem:[#allocation3 + $0x18] sm:$0xff]   ;;  %v729_v7 = vld [vmem:[#allocation3 + $0x20] sm:$0xff]   ;;  %v730_v8 = vld [vmem:[#allocation3 + $0x28] sm:$0xff]   ;;  %v77_v19 = vand.u32 127, %v76_v18  ;;  %s542_s13 = sshll.u32 %s860_s11, 4  ;;  %s543_s13 = int_to_ptr.vmem [resolvable:$true] %s542_s13 }
  0x39   :  { %646 = vmatprep.mubr.msk.bf16.mxu0 %vm858_vm0, %v857_v1  ;;  %686 = vmatprep.mubr.msk.bf16.mxu1 %vm858_vm0, %v857_v1  ;;  %v731_v9 = vld [vmem:[#allocation3 + $0x30] sm:$0xff]   ;;  %v732_v10 = vld [vmem:[#allocation3 + $0x38] sm:$0xff]   ;;  %v741_v11 = vld [vmem:[#allocation8] sm:$0xff]   ;;  %s823_s3 = scalar_lea.vmem %s543_s13, 128  ;;  %p828_p11 = scmp.lt.s32.totalorder %s543_s13, %s543_s13 }
  0x3a   :  { %631 = vmatpush3.bf16.msra.mxu0 %v725_v3  ;;  %671 = vmatpush3.bf16.msra.mxu1 %v741_v11  ;;  %v742_v12 = vld [vmem:[#allocation8 + $0x8] sm:$0xff]   ;;  %v743_v13 = vld [vmem:[#allocation8 + $0x10] sm:$0xff]   ;;  %v744_v14 = vld [vmem:[#allocation8 + $0x18] sm:$0xff]   ;;  %p824_p10 = scmp.ne.s32.totalorder %s543_s13, %s823_s3  ;;  %p829_p12 = scmp.lt.s32.totalorder %s823_s3, %s823_s3 }
  0x3b   :  { %632 = vmatprep.subr.bf16.mxu0 %v857_v1  ;;  %672 = vmatprep.subr.bf16.mxu1 %v857_v1  ;;  %v745_v15 = vld [vmem:[#allocation8 + $0x20] sm:$0xff]   ;;  %v746_v16 = vld [vmem:[#allocation8 + $0x28] sm:$0xff]   ;;  %v747_v17 = vld [vmem:[#allocation8 + $0x30] sm:$0xff]  }
  0x3c   :  { %v733_v21 = vld [vmem:[#allocation6] sm:$0xff]   ;;  %v734_v23 = vld [vmem:[#allocation6 + $0x8] sm:$0xff]   ;;  %v735_v24 = vld [vmem:[#allocation6 + $0x10] sm:$0xff]   ;;  %p830_p13 = por %p829_p12, %p828_p11 }
  0x3d   :  { %v736_v25 = vld [vmem:[#allocation6 + $0x18] sm:$0xff]   ;;  %v737_v26 = vld [vmem:[#allocation6 + $0x20] sm:$0xff]   ;;  %v738_v27 = vld [vmem:[#allocation6 + $0x28] sm:$0xff]  }
  0x3e   :  { %633 = vmatpush3.bf16.msra.mxu0 %v726_v4  ;;  %673 = vmatpush3.bf16.msra.mxu1 %v742_v12  ;;  %v739_v28 = vld [vmem:[#allocation6 + $0x30] sm:$0xff]   ;;  %v740_v29 = vld [vmem:[#allocation6 + $0x38] sm:$0xff]   ;;  %v189_v30 = vld [vmem:[%s1036_s0] sm:$0xf]  ;;  %p831_p0 = pnand %p830_p13, %p824_p10 }
  0x3f   :  { %634 = vmatprep.subr.bf16.mxu0 %v857_v1  ;;  %674 = vmatprep.subr.bf16.mxu1 %v857_v1  ;;  %v748_v31 = vld [vmem:[#allocation8 + $0x38] sm:$0xff]   ;;  %v749_v36 = vld [vmem:[#allocation8 + $0x40] sm:$0xff]   ;;  %v750_v39 = vld [vmem:[#allocation8 + $0x48] sm:$0xff]  }
  0x40   :  { %v751_v40 = vld [vmem:[#allocation8 + $0x50] sm:$0xff]   ;;  %v752_v41 = vld [vmem:[#allocation8 + $0x58] sm:$0xff]   ;;  %v753_v42 = vld [vmem:[#allocation8 + $0x60] sm:$0xff]  }
  0x41   :  { %v754_v43 = vld [vmem:[#allocation8 + $0x68] sm:$0xff]   ;;  %v755_v44 = vld [vmem:[#allocation8 + $0x70] sm:$0xff]   ;;  %v756_v45 = vld [vmem:[#allocation8 + $0x78] sm:$0xff]  }
  0x42   :  { %635 = vmatpush3.bf16.msra.mxu0 %v727_v5  ;;  %675 = vmatpush3.bf16.msra.mxu1 %v743_v13  ;;  %v575_v46 = vld [vmem:[%s1041_s5] ss:$0 sm:$0xff]  ;;  %v584_v55 = vld [vmem:[%s1041_s5 + $0x1] ss:$0 sm:$0xff] }
  0x43   :  { %636 = vmatprep.subr.bf16.mxu0 %v857_v1  ;;  %676 = vmatprep.subr.bf16.mxu1 %v857_v1  ;;  %v593_v62 = vld [vmem:[%s1042_s6] ss:$0 sm:$0xff] }
  0x46   :  { %637 = vmatpush3.bf16.msra.mxu0 %v728_v6  ;;  %677 = vmatpush3.bf16.msra.mxu1 %v744_v14 }
  0x47   :  { %638 = vmatprep.subr.bf16.mxu0 %v857_v1  ;;  %678 = vmatprep.subr.bf16.mxu1 %v857_v1 }
  0x4a   :  { %639 = vmatpush3.bf16.msra.mxu0 %v729_v7  ;;  %679 = vmatpush3.bf16.msra.mxu1 %v745_v15 }
  0x4b   :  { %640 = vmatprep.subr.bf16.mxu0 %v857_v1  ;;  %680 = vmatprep.subr.bf16.mxu1 %v857_v1 }
  0x4e   :  { %641 = vmatpush3.bf16.msra.mxu0 %v730_v8  ;;  %681 = vmatpush3.bf16.msra.mxu1 %v746_v16 }
  0x4f   :  { %642 = vmatprep.subr.bf16.mxu0 %v857_v1  ;;  %682 = vmatprep.subr.bf16.mxu1 %v857_v1 }
  0x52   :  { %643 = vmatpush3.bf16.msra.mxu0 %v731_v9  ;;  %683 = vmatpush3.bf16.msra.mxu1 %v747_v17 }
  0x53   :  { %644 = vmatprep.subr.bf16.mxu0 %v857_v1  ;;  %684 = vmatprep.subr.bf16.mxu1 %v857_v1 }
  0x56   :  { %645 = vmatpush3.bf16.msra.mxu0 %v732_v10  ;;  %685 = vmatpush3.bf16.msra.mxu1 %v748_v31 }
  0x57   :  { %650 = vmatprep.subr.bf16.mxu0 %v857_v1  ;;  %690 = vmatprep.subr.bf16.mxu1 %v857_v1 }
  0xb7   :  { %v80_v20 = vpop.permute.xlu0 %79 }
  0xb8   :  { %vm81_vm1 = vcmp.eq.s32.totalorder %v80_v20, %v77_v19 }
  0xb9   :  { %vm565_vm2 = vmpackc.low %vm81_vm1, %vm81_vm1 }
  0xba   :  { %647 = vmatmul.mubr.msk.bf16.vlgmr.msra.gmra.mrb[0].mxu0 %vm565_vm2, %v859_v22 }
  0xbb   :  { %651 = vmatpush3.bf16.msra.mxu0 %v733_v21  ;;  %666 = vmatprep.mubr.msk.bf16.mxu0 %vm858_vm0, %v857_v1 }
  0xbc   :  { %652 = vmatprep.subr.bf16.mxu0 %v857_v1 }
  0xbf   :  { %653 = vmatpush3.bf16.msra.mxu0 %v734_v23 }
  0xc0   :  { %654 = vmatprep.subr.bf16.mxu0 %v857_v1 }
  0xc3   :  { %655 = vmatpush3.bf16.msra.mxu0 %v735_v24 }
  0xc4   :  { %656 = vmatprep.subr.bf16.mxu0 %v857_v1 }
  0xc7   :  { %657 = vmatpush3.bf16.msra.mxu0 %v736_v25 }
  0xc8   :  { %658 = vmatprep.subr.bf16.mxu0 %v857_v1 }
  0xcb   :  { %659 = vmatpush3.bf16.msra.mxu0 %v737_v26 }
  0xcc   :  { %660 = vmatprep.subr.bf16.mxu0 %v857_v1 }
  0xcf   :  { %661 = vmatpush3.bf16.msra.mxu0 %v738_v27 }
  0xd0   :  { %662 = vmatprep.subr.bf16.mxu0 %v857_v1 }
  0xd3   :  { %663 = vmatpush3.bf16.msra.mxu0 %v739_v28 }
  0xd4   :  { %664 = vmatprep.subr.bf16.mxu0 %v857_v1 }
  0xd7   :  { %665 = vmatpush3.bf16.msra.mxu0 %v740_v29 }
  0xda   :  { %667 = vmatmul.mubr.bf16.vlgmr.msra.gmra.mrb[0].mxu0 %v189_v30 }
 0x1ad   :  { %v288_v32 = vpop.f32.mrb[0].mxu0 }
 0x1ae   :  { %v294_v33 = vmax.f32 %v288_v32, 0.0  ;;  %v668_v34 = vpop.f32.mrb[1].mxu0 }
 0x1af   :  { %v291_v35 = vpop.f32.mrb[2].mxu0 }
 0x1b0   :  { %v295_v37 = vpack.c.bf16 %v294_v33, %v294_v33  ;;  %v669_v38 = vpop.f32.mrb[3].mxu0 }
 0x1b2   :  { %687 = vmatmul.mubr.bf16.vlgmr.msra.gmra.mrb[0].mxu1 %v295_v37 }
 0x1b3   :  { %691 = vmatpush3.bf16.msra.mxu1 %v749_v36  ;;  %706 = vmatprep.mubr.msk.bf16.mxu1 %vm858_vm0, %v857_v1 }
 0x1b4   :  { %692 = vmatprep.subr.bf16.mxu1 %v857_v1 }
 0x1b7   :  { %693 = vmatpush3.bf16.msra.mxu1 %v750_v39 }
 0x1b8   :  { %694 = vmatprep.subr.bf16.mxu1 %v857_v1 }
 0x1bb   :  { %695 = vmatpush3.bf16.msra.mxu1 %v751_v40 }
 0x1bc   :  { %696 = vmatprep.subr.bf16.mxu1 %v857_v1 }
 0x1bf   :  { %697 = vmatpush3.bf16.msra.mxu1 %v752_v41 }
 0x1c0   :  { %698 = vmatprep.subr.bf16.mxu1 %v857_v1 }
 0x1c3   :  { %699 = vmatpush3.bf16.msra.mxu1 %v753_v42 }
 0x1c4   :  { %700 = vmatprep.subr.bf16.mxu1 %v857_v1 }
 0x1c7   :  { %701 = vmatpush3.bf16.msra.mxu1 %v754_v43 }
 0x1c8   :  { %702 = vmatprep.subr.bf16.mxu1 %v857_v1 }
 0x1cb   :  { %703 = vmatpush3.bf16.msra.mxu1 %v755_v44 }
 0x1cc   :  { %704 = vmatprep.subr.bf16.mxu1 %v857_v1 }
 0x1cf   :  { %705 = vmatpush3.bf16.msra.mxu1 %v756_v45 }
 0x285   :  { %v399_v47 = vpop.f32.mrb[0].mxu1 }
 0x286   :  { %v400_v48 = vadd.f32 %v575_v46, %v399_v47  ;;  %v688_v49 = vpop.f32.mrb[1].mxu1 }
 0x287   :  { %v402_v50 = vpop.f32.mrb[2].mxu1 }
 0x288   :  { %v405_v51 = vmax.f32 %v400_v48, 0.0  ;;  %v689_v52 = vpop.f32.mrb[3].mxu1 }
 0x28a   :  { %v406_v53 = vadd.f32 %v405_v51, %v294_v33 }
 0x28c   :  { %v407_v54 = vpack.c.bf16 %v406_v53, %v406_v53 }
 0x28e   :  { %707 = vmatmul.mubr.bf16.vlgmr.msra.gmra.mrb[4].mxu1 %v407_v54 }
 0x361   :  { %v512_v56 = vpop.f32.mrb[4].mxu1 }
 0x362   :  { %v513_v57 = vadd.f32 %v584_v55, %v512_v56  ;;  %v708_v58 = vpop.f32.mrb[5].mxu1 }
 0x363   :  { %v515_v59 = vpop.f32.mrb[6].mxu1 }
 0x364   :  { %v518_v60 = vmax.f32 %v513_v57, 0.0  ;;  %v709_v61 = vpop.f32.mrb[7].mxu1 }
 0x366   :  { %v519_v63 = vadd.f32 %v518_v60, %v406_v53 }
 0x368   :  { %520 = vst [vmem:[#allocation9] sm:$0xff] %v519_v63  ;;  %v528_v0 = vmul.f32 %v593_v62, %v519_v63 }
 0x36a   :  { %529 = vadd.xlane.f32.xlu0 %v528_v0 }
 0x36b   :  { %834 = shalt.err (!%p831_p0)
}
 0x36c   :  { %s835_s14 = scalar_lea.hbm %s1044_s8, 128 }
 0x36d   :  { %p836_p1 = scmp.ne.s32.totalorder %s1044_s8, %s835_s14  ;;  %p839_p2 = scmp.lt.u32.totalorder %s835_s14, %s1044_s8 }
 0x36f   :  { %p841_p3 = pnand %p839_p2, %p836_p1 }
 0x371   :  { %844 = shalt.err (!%p841_p3)
}
 0x372   :  { %545 = dma.vmem_to_hbm [thread:$0]  %s543_s13, 128, %s1044_s8, [#allocation5]   ;;  %v532_v1 = vstv %s1043_s7  ;;  %vm534_vm3 = vcmask 7168  }
 0x3f7   :  { %v530_v2 = vpop.xlane.xlu0 %529 }
 0x3f8   :  { %v533_v3 = vadd.f32 %v532_v1, %v530_v2 }
 0x3fa   :  { %535 = vst.msk [vmem:[%s1045_s9] sm:$0xff] %vm534_vm3, %v533_v3 }
 0x3fb   :  { %849 = dma.done.wait [#allocation5], 128  }
 0x3fc   :  { %850 = vsyncadd [#allocation5], 4294967168 }
 0x3fd   :  { %553 = vsyncpa [#allocation4], 1 }
 0x3fe   :  { %554 = vsyncpa [#allocation7], 1 }
 0x3ff   :  { %555 = vsyncpa [#allocation5], 1 }

</bundles_post_ra>
